<compile_context>
chip_gen: v7x
topology: tpu7x:2x2x1
jax: 0.10.0
libtpu: 0.0.40
codegen_flags: <defaults>
</compile_context>

<pallas_src>
import math
import jax
import jax.numpy as jnp
from jax.experimental import pallas as pl
from jax.experimental.pallas import tpu as pltpu


def _make_kernel(num_stacks):
    """Fused ResidualBlock kernel for a fixed number of conv stacks."""

    def kernel(x_ref, wf_ref, shift_ref, fcT_ref, o_ref):
        # x_ref / o_ref blocks: (1, C, W); weight blocks are full arrays.
        x = x_ref[0, :, :].astype(jnp.float32)          # (C, W) identity
        cur = x

        # Dilated conv stack: per stack, one fused MXU contraction.
        for i in range(num_stacks):
            wf = wf_ref[i, :, :]                        # (C, 2C) fused taps
            s = shift_ref[i, :, :]                      # (W, W) shift-by-2**i
            # shifted[:, t] = cur[:, t + 2**i]  (zero past the end).
            shifted = jnp.dot(cur, s, preferred_element_type=jnp.float32)
            stacked = jnp.concatenate([cur, shifted], axis=0)   # (2C, W)
            cur = jnp.maximum(
                jnp.dot(wf, stacked, preferred_element_type=jnp.float32), 0.0)

        # fc over time: (C, W) @ (W, W_out). Zero rows of fcT kill the
        # invalid tail of `cur`, so no extra masking is needed.
        z = jnp.dot(cur, fcT_ref[...], preferred_element_type=jnp.float32)

        o_ref[0, :, :] = (jnp.maximum(z, 0.0) + x).astype(o_ref.dtype)

    return kernel


def residual_block_pallas(x, conv_weights, fc_weight):
    """ResidualBlock forward in one Pallas call (grid over the batch axis).

    x            : (N, C, W) float32
    conv_weights : list of (C, C, 2) Conv1d weights (dilation 2**i, no bias)
    fc_weight    : (W, out_length) Linear weight (bias=False)
    """
    N, C, W = x.shape
    num_stacks = len(conv_weights)
    out_length = W - 2 ** num_stacks + 1
    assert fc_weight.shape == (W, out_length)

    # ---- wrapper-side weight preprocessing (plain XLA, done once) ---------
    # Fuse the two conv taps: (C_out, C_in, 2) -> (C_out, 2*C_in).
    wf = jnp.stack(
        [jnp.concatenate([w[:, :, 0], w[:, :, 1]], axis=1) for w in conv_weights],
        axis=0).astype(jnp.float32)                              # (S, C, 2C)
    # Time-shift operators: cur @ shift_mats[i] == cur shifted left by 2**i,
    # with zeros past the end (keeps a fixed-width, fixed-layout buffer).
    shift_mats = jnp.stack(
        [jnp.eye(W, dtype=jnp.float32, k=-(2 ** i)) for i in range(num_stacks)],
        axis=0)                                                  # (S, W, W)
    # fc weight pre-transposed to (out_length, W_out) and zero-padded to
    # (W, W_out): zero rows annihilate the invalid (stale) time positions.
    fcT = jnp.zeros((W, W), jnp.float32).at[:out_length, :].set(
        fc_weight.astype(jnp.float32).T)

    kernel = _make_kernel(num_stacks)

    return pl.pallas_call(
        kernel,
        out_shape=jax.ShapeDtypeStruct(x.shape, x.dtype),
        grid=(N,),
        in_specs=[
            pl.BlockSpec((1, C, W), lambda n: (n, 0, 0)),          # x (per batch)
            pl.BlockSpec(wf.shape, lambda n: (0, 0, 0)),           # fused conv weights
            pl.BlockSpec(shift_mats.shape, lambda n: (0, 0, 0)),   # shift operators
            pl.BlockSpec(fcT.shape, lambda n: (0, 0)),             # fc (T + padded)
        ],
        out_specs=pl.BlockSpec((1, C, W), lambda n: (n, 0, 0)),
        compiler_params=pltpu.CompilerParams(
            dimension_semantics=("parallel",)),
    )(x, wf, shift_mats, fcT)


def residual_block_ref(x, conv_weights, fc_weight):
    """Plain-JAX reference mirroring the PyTorch forward pass."""
    x = x.astype(jnp.float32)
    cur = x
    for i, w in enumerate(conv_weights):
        d = 2 ** i
        L = cur.shape[2]
        y = (jnp.einsum('oc,ncl->nol', w[:, :, 0], cur[:, :, : L - d])
             + jnp.einsum('oc,ncl->nol', w[:, :, 1], cur[:, :, d:]))
        cur = jnp.maximum(y, 0.0)
    z = jnp.einsum('ncl,wl->ncw', cur, fc_weight)
    return jnp.maximum(z, 0.0) + x


if __name__ == "__main__":
    # Module hyper-parameters (small, but non-degenerate out_length).
    num_channels = 4
    window_size = 20                       # num_stacks = 4, out_length = 5
    batch = 2

    num_stacks = math.floor(math.log2(window_size))
    out_length = window_size - 2 ** num_stacks + 1

    key = jax.random.PRNGKey(0)
    keys = jax.random.split(key, num_stacks + 2)

    # Deterministic synthetic parameters (shapes match nn.Conv1d / nn.Linear).
    conv_weights = []
    for i in range(num_stacks):
        fan_in = num_channels * 2
        w = jax.random.normal(keys[i], (num_channels, num_channels, 2),
                              dtype=jnp.float32) / jnp.sqrt(fan_in)
        conv_weights.append(w)
    fc_weight = jax.random.normal(keys[num_stacks],
                                  (window_size, out_length),
                                  dtype=jnp.float32) / jnp.sqrt(out_length)

    x = jax.random.normal(keys[num_stacks + 1],
                          (batch, num_channels, window_size),
                          dtype=jnp.float32)

    out = residual_block_pallas(x, conv_weights, fc_weight)
    out = jax.block_until_ready(out)

    ref = residual_block_ref(x, conv_weights, fc_weight)
    assert out.shape == x.shape and out.dtype == x.dtype
    assert jnp.allclose(out, ref, atol=1e-5, rtol=1e-5), "mismatch vs reference"

    print("KERNEL_OK")
</pallas_src>

<mosaic_0001>
module attributes {stable_mosaic.version = 11 : i64} {
  func.func @kernel(%arg0: i32, %arg1: memref<1x4x20xf32, #tpu.memory_space<vmem>>, %arg2: memref<4x4x8xf32, #tpu.memory_space<vmem>>, %arg3: memref<4x20x20xf32, #tpu.memory_space<vmem>>, %arg4: memref<20x20xf32, #tpu.memory_space<vmem>>, %arg5: memref<1x4x20xf32, #tpu.memory_space<vmem>>) attributes {dimension_semantics = [#tpu.dimension_semantics<parallel>], iteration_bounds = array<i64: 2>, scalar_prefetch = 0 : i64, scratch_operands = 0 : i64, tpu.core_type = #tpu.core_type<tc>, window_params = [{transform_indices = @transform_0, window_bounds = array<i64: 1, 4, 20>}, {pipeline_mode = #tpu.pipeline_mode<synchronous>, transform_indices = @transform_1, window_bounds = array<i64: 4, 4, 8>}, {pipeline_mode = #tpu.pipeline_mode<synchronous>, transform_indices = @transform_2, window_bounds = array<i64: 4, 20, 20>}, {pipeline_mode = #tpu.pipeline_mode<synchronous>, transform_indices = @transform_3, window_bounds = array<i64: 20, 20>}, {transform_indices = @transform_4, window_bounds = array<i64: 1, 4, 20>}]} {
    %c0 = arith.constant 0 : index
    %c0_0 = arith.constant 0 : index
    %c0_1 = arith.constant 0 : index
    %0 = vector.load %arg1[%c0, %c0_0, %c0_1] : memref<1x4x20xf32, #tpu.memory_space<vmem>>, vector<1x4x20xf32>
    %1 = vector.shape_cast %0 : vector<1x4x20xf32> to vector<4x20xf32>
    %c0_2 = arith.constant 0 : index
    %c0_3 = arith.constant 0 : index
    %c0_4 = arith.constant 0 : index
    %2 = vector.load %arg2[%c0_2, %c0_3, %c0_4] : memref<4x4x8xf32, #tpu.memory_space<vmem>>, vector<1x4x8xf32>
    %3 = vector.shape_cast %2 : vector<1x4x8xf32> to vector<4x8xf32>
    %c0_5 = arith.constant 0 : index
    %c0_6 = arith.constant 0 : index
    %c0_7 = arith.constant 0 : index
    %4 = vector.load %arg3[%c0_5, %c0_6, %c0_7] : memref<4x20x20xf32, #tpu.memory_space<vmem>>, vector<1x20x20xf32>
    %5 = vector.shape_cast %4 : vector<1x20x20xf32> to vector<20x20xf32>
    %cst = arith.constant dense<0.000000e+00> : vector<4x20xf32>
    %6 = tpu.matmul %1, %5, %cst {dimension_numbers = #tpu.dot_dimension_numbers<[1], [0], [0], [1], [0, 0, 1, 1], [], []>} : vector<4x20xf32>, vector<20x20xf32>, vector<4x20xf32> -> vector<4x20xf32>
    %7 = tpu.concatenate %1, %6 in 0 : vector<4x20xf32>, vector<4x20xf32> -> vector<8x20xf32>
    %cst_8 = arith.constant dense<0.000000e+00> : vector<4x20xf32>
    %8 = tpu.matmul %3, %7, %cst_8 {dimension_numbers = #tpu.dot_dimension_numbers<[1], [0], [0], [1], [0, 0, 1, 1], [], []>} : vector<4x8xf32>, vector<8x20xf32>, vector<4x20xf32> -> vector<4x20xf32>
    %cst_9 = arith.constant 0.000000e+00 : f32
    %9 = vector.broadcast %cst_9 : f32 to vector<4x20xf32>
    %10 = arith.maximumf %8, %9 : vector<4x20xf32>
    %c1 = arith.constant 1 : index
    %c0_10 = arith.constant 0 : index
    %c0_11 = arith.constant 0 : index
    %11 = vector.load %arg2[%c1, %c0_10, %c0_11] : memref<4x4x8xf32, #tpu.memory_space<vmem>>, vector<1x4x8xf32>
    %12 = vector.shape_cast %11 : vector<1x4x8xf32> to vector<4x8xf32>
    %c1_12 = arith.constant 1 : index
    %c0_13 = arith.constant 0 : index
    %c0_14 = arith.constant 0 : index
    %13 = vector.load %arg3[%c1_12, %c0_13, %c0_14] : memref<4x20x20xf32, #tpu.memory_space<vmem>>, vector<1x20x20xf32>
    %14 = vector.shape_cast %13 : vector<1x20x20xf32> to vector<20x20xf32>
    %cst_15 = arith.constant dense<0.000000e+00> : vector<4x20xf32>
    %15 = tpu.matmul %10, %14, %cst_15 {dimension_numbers = #tpu.dot_dimension_numbers<[1], [0], [0], [1], [0, 0, 1, 1], [], []>} : vector<4x20xf32>, vector<20x20xf32>, vector<4x20xf32> -> vector<4x20xf32>
    %16 = tpu.concatenate %10, %15 in 0 : vector<4x20xf32>, vector<4x20xf32> -> vector<8x20xf32>
    %cst_16 = arith.constant dense<0.000000e+00> : vector<4x20xf32>
    %17 = tpu.matmul %12, %16, %cst_16 {dimension_numbers = #tpu.dot_dimension_numbers<[1], [0], [0], [1], [0, 0, 1, 1], [], []>} : vector<4x8xf32>, vector<8x20xf32>, vector<4x20xf32> -> vector<4x20xf32>
    %cst_17 = arith.constant 0.000000e+00 : f32
    %18 = vector.broadcast %cst_17 : f32 to vector<4x20xf32>
    %19 = arith.maximumf %17, %18 : vector<4x20xf32>
    %c2 = arith.constant 2 : index
    %c0_18 = arith.constant 0 : index
    %c0_19 = arith.constant 0 : index
    %20 = vector.load %arg2[%c2, %c0_18, %c0_19] : memref<4x4x8xf32, #tpu.memory_space<vmem>>, vector<1x4x8xf32>
    %21 = vector.shape_cast %20 : vector<1x4x8xf32> to vector<4x8xf32>
    %c2_20 = arith.constant 2 : index
    %c0_21 = arith.constant 0 : index
    %c0_22 = arith.constant 0 : index
    %22 = vector.load %arg3[%c2_20, %c0_21, %c0_22] : memref<4x20x20xf32, #tpu.memory_space<vmem>>, vector<1x20x20xf32>
    %23 = vector.shape_cast %22 : vector<1x20x20xf32> to vector<20x20xf32>
    %cst_23 = arith.constant dense<0.000000e+00> : vector<4x20xf32>
    %24 = tpu.matmul %19, %23, %cst_23 {dimension_numbers = #tpu.dot_dimension_numbers<[1], [0], [0], [1], [0, 0, 1, 1], [], []>} : vector<4x20xf32>, vector<20x20xf32>, vector<4x20xf32> -> vector<4x20xf32>
    %25 = tpu.concatenate %19, %24 in 0 : vector<4x20xf32>, vector<4x20xf32> -> vector<8x20xf32>
    %cst_24 = arith.constant dense<0.000000e+00> : vector<4x20xf32>
    %26 = tpu.matmul %21, %25, %cst_24 {dimension_numbers = #tpu.dot_dimension_numbers<[1], [0], [0], [1], [0, 0, 1, 1], [], []>} : vector<4x8xf32>, vector<8x20xf32>, vector<4x20xf32> -> vector<4x20xf32>
    %cst_25 = arith.constant 0.000000e+00 : f32
    %27 = vector.broadcast %cst_25 : f32 to vector<4x20xf32>
    %28 = arith.maximumf %26, %27 : vector<4x20xf32>
    %c3 = arith.constant 3 : index
    %c0_26 = arith.constant 0 : index
    %c0_27 = arith.constant 0 : index
    %29 = vector.load %arg2[%c3, %c0_26, %c0_27] : memref<4x4x8xf32, #tpu.memory_space<vmem>>, vector<1x4x8xf32>
    %30 = vector.shape_cast %29 : vector<1x4x8xf32> to vector<4x8xf32>
    %c3_28 = arith.constant 3 : index
    %c0_29 = arith.constant 0 : index
    %c0_30 = arith.constant 0 : index
    %31 = vector.load %arg3[%c3_28, %c0_29, %c0_30] : memref<4x20x20xf32, #tpu.memory_space<vmem>>, vector<1x20x20xf32>
    %32 = vector.shape_cast %31 : vector<1x20x20xf32> to vector<20x20xf32>
    %cst_31 = arith.constant dense<0.000000e+00> : vector<4x20xf32>
    %33 = tpu.matmul %28, %32, %cst_31 {dimension_numbers = #tpu.dot_dimension_numbers<[1], [0], [0], [1], [0, 0, 1, 1], [], []>} : vector<4x20xf32>, vector<20x20xf32>, vector<4x20xf32> -> vector<4x20xf32>
    %34 = tpu.concatenate %28, %33 in 0 : vector<4x20xf32>, vector<4x20xf32> -> vector<8x20xf32>
    %cst_32 = arith.constant dense<0.000000e+00> : vector<4x20xf32>
    %35 = tpu.matmul %30, %34, %cst_32 {dimension_numbers = #tpu.dot_dimension_numbers<[1], [0], [0], [1], [0, 0, 1, 1], [], []>} : vector<4x8xf32>, vector<8x20xf32>, vector<4x20xf32> -> vector<4x20xf32>
    %cst_33 = arith.constant 0.000000e+00 : f32
    %36 = vector.broadcast %cst_33 : f32 to vector<4x20xf32>
    %37 = arith.maximumf %35, %36 : vector<4x20xf32>
    %c0_34 = arith.constant 0 : index
    %c0_35 = arith.constant 0 : index
    %38 = vector.load %arg4[%c0_34, %c0_35] : memref<20x20xf32, #tpu.memory_space<vmem>>, vector<20x20xf32>
    %cst_36 = arith.constant dense<0.000000e+00> : vector<4x20xf32>
    %39 = tpu.matmul %37, %38, %cst_36 {dimension_numbers = #tpu.dot_dimension_numbers<[1], [0], [0], [1], [0, 0, 1, 1], [], []>} : vector<4x20xf32>, vector<20x20xf32>, vector<4x20xf32> -> vector<4x20xf32>
    %cst_37 = arith.constant 0.000000e+00 : f32
    %40 = vector.broadcast %cst_37 : f32 to vector<4x20xf32>
    %41 = arith.maximumf %39, %40 : vector<4x20xf32>
    %42 = arith.addf %41, %1 : vector<4x20xf32>
    %c0_38 = arith.constant 0 : index
    %c0_39 = arith.constant 0 : index
    %c0_40 = arith.constant 0 : index
    %43 = vector.load %arg5[%c0_38, %c0_39, %c0_40] : memref<1x4x20xf32, #tpu.memory_space<vmem>>, vector<1x4x20xf32>
    %44 = vector.shape_cast %43 : vector<1x4x20xf32> to vector<4x20xf32>
    %45 = vector.shape_cast %42 : vector<4x20xf32> to vector<1x4x20xf32>
    tpu.vector_store %arg5[%c0_38, %c0_39, %c0_40], %45 {strides = array<i32>} : memref<1x4x20xf32, #tpu.memory_space<vmem>>, vector<1x4x20xf32>,
    return
  }
  func.func @transform_0(%arg0: i32) -> (i32, i32, i32) {
    %c0_i32 = arith.constant 0 : i32
    %c0_i32_0 = arith.constant 0 : i32
    %c0_i32_1 = arith.constant 0 : i32
    return %arg0, %c0_i32, %c0_i32_0 : i32, i32, i32
  }
  func.func @transform_1(%arg0: i32) -> (i32, i32, i32) {
    %c0_i32 = arith.constant 0 : i32
    %c0_i32_0 = arith.constant 0 : i32
    %c0_i32_1 = arith.constant 0 : i32
    %c0_i32_2 = arith.constant 0 : i32
    return %c0_i32, %c0_i32_0, %c0_i32_1 : i32, i32, i32
  }
  func.func @transform_2(%arg0: i32) -> (i32, i32, i32) {
    %c0_i32 = arith.constant 0 : i32
    %c0_i32_0 = arith.constant 0 : i32
    %c0_i32_1 = arith.constant 0 : i32
    %c0_i32_2 = arith.constant 0 : i32
    return %c0_i32, %c0_i32_0, %c0_i32_1 : i32, i32, i32
  }
  func.func @transform_3(%arg0: i32) -> (i32, i32) {
    %c0_i32 = arith.constant 0 : i32
    %c0_i32_0 = arith.constant 0 : i32
    %c0_i32_1 = arith.constant 0 : i32
    return %c0_i32, %c0_i32_0 : i32, i32
  }
  func.func @transform_4(%arg0: i32) -> (i32, i32, i32) {
    %c0_i32 = arith.constant 0 : i32
    %c0_i32_0 = arith.constant 0 : i32
    %c0_i32_1 = arith.constant 0 : i32
    return %arg0, %c0_i32, %c0_i32_0 : i32, i32, i32
  }
}

</mosaic_0001>

<bundles_post_ra>
// kernel: tpu_custom_call.1
= control target key start
LH: loop header
LB: loop body
LE: loop exit
PB: predicated region body
PF: predicated region fallthrough
CT: control target
= control target key end

     0   :  { %9 = vsyncpa [#allocation3], 0  ;;  %s1482_s0 = inlined_call_operand.vmem [shape: f32[2,4,20], index: 0, kind: input, shape index: {}]   ;;  %s1483_s1 = inlined_call_operand.vmem [shape: f32[4,4,8], index: 1, kind: input, shape index: {}]   ;;  %s1484_s2 = inlined_call_operand.vmem [shape: f32[4,20,20], index: 2, kind: input, shape index: {}]   ;;  %s1485_s3 = inlined_call_operand.vmem [shape: f32[20,20], index: 3, kind: input, shape index: {}]   ;;  %s1486_s4 = inlined_call_operand.hbm [shape: f32[2,4,20], index: 4, kind: output, shape index: {}]  }
   0x1   :  { %11 = vsyncpa [#allocation3 + $0x1], 0  ;;  %s1270_s15 = smov 0   ;;  %s1272_s16 = smov 0  }
   0x2   :  { %s1274_s17 = smov 0   ;;  %s1276_s18 = smov 0  }
   0x3 LB: > { %s1291_s19 = sadd.s32 4294967295, %s1239_s18   ;;  %s991_s20 = sadd.s32 4294967294, %s1239_s18   ;;  %s1239_s18 = sphi %s1276_s18, %s1492_s18   ;;  %s1235_s17 = sphi %s1274_s17, %s1491_s17   ;;  %s1231_s16 = sphi %s1272_s16, %s1490_s16   ;;  %s1227_s15 = sphi %s1270_s15, %s1489_s15  }
   0x4   : > { %s1295_s21 = sadd.s32 1, %s1239_s18   ;;  %s113_s22 = sadd.s32 1, %s1235_s17 }
   0x5   : > { %s110_s23 = ssub.s32 %s1239_s18, %s1295_s21  ;;  %p123_p0 = scmp.ne.s32.totalorder %s1235_s17, %s1231_s16 }
   0x6   : > { %p111_p1 = scmp.eq.s32.totalorder %s110_s23, 0  ;;  %p124_p2 = scmp.eq.s32.totalorder %s1291_s19, 1 }
   0x7   : > { %p129_p3 = scmp.ne.s32.totalorder %s1231_s16, %s1227_s15  ;;  %p130_p4 = scmp.eq.s32.totalorder %s991_s20, 1 }
   0x8   : > { %s1306_s24 = scalar_select %p111_p1, %s1235_s17, %s113_s22  }
   0x9   : > { %p1308_p5 = por %p124_p2, %p123_p0  ;;  %p1312_p6 = por %p130_p4, %p129_p3 }
   0xa   : > { %p994_p7 = scmp.ge.s32.totalorder %s1239_s18, 1  ;;  %p164_p8 = scmp.lt.s32.totalorder %s1239_s18, 3 }
   0xc   : > { %p165_p9 = pnand %p994_p7, %p164_p8 }
   0xd   : > { %v195_v0 = vld [vmem:[%s1484_s2] sm:$0xff] (!%p165_p9)  ;;  %v196_v1 = vld [vmem:[%s1484_s2 + $0x8] sm:$0xff] (!%p165_p9)  ;;  %v1241_v2 = vmov (!%p165_p9), 0.0|0.0   ;;  %p189_p10 = scmp.lt.s32.totalorder (!%p165_p9), %s1291_s19, 1  ;;  %v1242_v4 = vmov (!%p165_p9), 0.0   ;;  %vm1243_vm0 = vmmov (!%p165_p9), 0  }
   0xe   : > { %168 = sbr.rel (%p165_p9) target bundleno = 1976 (0x7b8), region = 36  ;;  %1120 = vmatprep.subr.bf16.mxu0 (!%p165_p9), %v1241_v2  ;;  %v1121_v3 = vpack.c.bf16 (!%p165_p9), %v196_v1, %v195_v0  ;;  %1064 = vmatprep.subr.mxu1 (!%p165_p9), %v1242_v4  ;;  %v197_v5 = vld [vmem:[%s1484_s2 + $0x10] sm:$0xf] (!%p165_p9)  ;;  %vm202_vm1 = vcmask (!%p165_p9), 1043456   ;;  %vm198_vm2 = vcmask (!%p165_p9), 162816   ;;  %v1001_v7 = vld [vmem:[%s1484_s2 + $0x18] sm:$0xff] (!%p165_p9) }
   0xf   : > { %1061 = vmatprep.mubr.msk.f32.mxu0 (!%p165_p9), %vm1243_vm0, %v1242_v4  ;;  %1066 = vmatprep.mubr.msk.f32.mxu1 (!%p165_p9), %vm1243_vm0, %v1242_v4  ;;  %v1002_v8 = vld [vmem:[%s1484_s2 + $0x20] sm:$0xff] (!%p165_p9)  ;;  %vm280_vm3 = vcmask (!%p165_p9), 64512   ;;  %v1003_v15 = vld [vmem:[%s1484_s2 + $0x28] sm:$0xf] (!%p165_p9)  ;;  %v1008_v19 = vld [vmem:[%s1484_s2 + $0x30] sm:$0xff] (!%p165_p9)  ;;  %s186_s10 = sand.u32 (!%p165_p9), 1, %s1231_s16  }
  0x10   : > { %1122 = vmatpush3.bf16.msra.mxu0 (!%p165_p9), %v1121_v3  ;;  %v194_v12 = vld [vmem:[%s1483_s1] sm:$0xf] (!%p165_p9)  ;;  %v1124_v13 = vpack.c.bf16 (!%p165_p9), %v1002_v8, %v1001_v7  ;;  %v1009_v20 = vld [vmem:[%s1484_s2 + $0x38] sm:$0xff] (!%p165_p9)  ;;  %v1000_v25 = vld [vmem:[%s1483_s1 + $0x4] sm:$0xf] (!%p165_p9)  ;;  %s1024_s12 = sshll.u32 (!%p165_p9), %s1291_s19, 6 }
  0x11   : > { %1059 = vmatprep.subr.mxu0 (!%p165_p9), %v1242_v4  ;;  %v1127_v21 = vpack.c.bf16 (!%p165_p9), %v1009_v20, %v1008_v19  ;;  %v1010_v27 = vld [vmem:[%s1484_s2 + $0x40] sm:$0xf] (!%p165_p9)  ;;  %v1015_v31 = vld [vmem:[%s1484_s2 + $0x48] sm:$0xff] (!%p165_p9)  ;;  %v1016_v32 = vld [vmem:[%s1484_s2 + $0x50] sm:$0xff] (!%p165_p9)  ;;  %vm916_vm4 = vcmask (!%p165_p9), 158720   ;;  %s1440_s23 = scalar_lea.hbm (!%p165_p9), %s1486_s4, %s1024_s12  ;;  %s919_s27 = scalar_lea.sflag (!%p165_p9), [#allocation3], %s186_s10 }
  0x12   : > { %v1007_v36 = vld [vmem:[%s1483_s1 + $0x8] sm:$0xf] (!%p165_p9)  ;;  %v1130_v37 = vpack.c.bf16 (!%p165_p9), %v1016_v32, %v1015_v31  ;;  %v1017_v39 = vld [vmem:[%s1484_s2 + $0x58] sm:$0xf] (!%p165_p9)  ;;  %v835_v43 = vld [vmem:[%s1485_s3] sm:$0xff] (!%p165_p9)  ;;  %s1244_s28 = smov (!%p165_p9), [#allocation2]  }
  0x13   : > { %v836_v44 = vld [vmem:[%s1485_s3 + $0x8] sm:$0xff] (!%p165_p9)  ;;  %v837_v51 = vld [vmem:[%s1485_s3 + $0x10] sm:$0xf] (!%p165_p9)  ;;  %s1181_s29 = sshll.u32 (!%p165_p9), %s1244_s28, 4  ;;  %s1182_s29 = int_to_ptr.vmem [resolvable:$false] %s1181_s29 }
  0x14   : > { %1060 = vmatpush3.msk.msra.mxu0 (!%p165_p9), %vm202_vm1, %v197_v5  ;;  %v1014_v48 = vld [vmem:[%s1483_s1 + $0xc] sm:$0xf] (!%p165_p9)  ;;  %v1133_v49 = vpack.c.bf16 (!%p165_p9), %v836_v44, %v835_v43  ;;  %s1183_s30 = scalar_lea.vmem (!%p165_p9), %s1182_s29, 128 }
  0x15   : > { %s190_s5 = scalar_select %p189_p10, %s1291_s19, 1  ;;  %1078 = vmatprep.subr.mxu0 %v1242_v4 }
  0x17   : > { %s996_s8 = sshll.u32 %s190_s5, 2 }
  0x18   : > { %s192_s11 = scalar_lea.vmem %s1482_s0, %s996_s8 }
  0x19   : > { %v1340_v6 = vld [vmem:[%s192_s11] sm:$0xf]  ;;  %s995_s11 = sshll.u32 %s186_s10, 2 }
  0x1a   : > { %1062 = vmatmul.mubr.msk.f32.vlgmr.msra.gmra.mrb[0].mxu0 %vm198_vm2, %v1340_v6  ;;  %s188_s13 = scalar_lea.vmem [#allocation2], %s995_s11 }
  0x1b   : > { %1080 = vmatprep.mubr.msk.f32.mxu0 %vm1243_vm0, %v1242_v4  ;;  %s932_s14 = sshll.u32 %s188_s13, 4  ;;  %s1442_s14 = int_to_ptr.vmem [resolvable:$true] %s932_s14 }
  0x1c   : > { %s1177_s19 = scalar_lea.vmem %s1442_s14, 64  ;;  %p1184_p0 = scmp.lt.s32.totalorder %s1442_s14, %s1182_s29 }
  0x1d   : > { %p1178_p11 = scmp.ne.s32.totalorder %s1442_s14, %s1177_s19  ;;  %p1185_p1 = scmp.lt.s32.totalorder %s1183_s30, %s1177_s19 }
  0x1f   : > { %p1179_p12 = pnand %p1178_p11, %p1308_p5  ;;  %p1186_p2 = por %p1185_p1, %p1184_p0 }
  0x21   : > { %p1180_p13 = pneg %p1179_p12 }
  0x23   : > { %p1187_p3 = pnand %p1186_p2, %p1180_p13 }
  0xed   : > { %v272_v9 = vpop.f32.mrb[0].mxu0 }
  0xee   : > { %v277_v10 = vrot.slane %v272_v9, 4  ;;  %v1063_v11 = vpop.f32.mrb[1].mxu0 }
  0xf0   : > { %v279_v14 = vsel %vm202_vm1, %v1340_v6, %v277_v10 }
  0xf1   : > { %1065 = vmatpush3.msra.mxu1 %v279_v14 }
  0xf2   : > { %1067 = vmatmul.mubr.msk.f32.vlgmr.msra.gmra.mrb[0].mxu1 %vm280_vm3, %v194_v12  ;;  %1123 = vmatprep.subr.bf16.mxu1 %v1241_v2 }
  0xf3   : > { %1125 = vmatpush3.bf16.msra.mxu1 %v1124_v13  ;;  %1075 = vmatprep.mubr.msk.f32.mxu1 %vm1243_vm0, %v1242_v4 }
  0xf4   : > { %1073 = vmatprep.subr.mxu1 %v1242_v4 }
  0xf7   : > { %1074 = vmatpush3.msk.msra.mxu1 %vm202_vm1, %v1003_v15 }
  0xf8   : > { %1126 = vmatprep.subr.bf16.mxu1 %v1241_v2 }
 0x1c5   : > { %v350_v16 = vpop.f32.mrb[0].mxu1 }
 0x1c6   : > { %v354_v17 = vmax.f32 %v350_v16, 0.0  ;;  %v1068_v18 = vpop.f32.mrb[1].mxu1 }
 0x1c8   : > { %1076 = vmatmul.mubr.msk.f32.vlgmr.msra.gmra.mrb[2].mxu1 %vm198_vm2, %v354_v17 }
 0x1c9   : > { %1089 = vmatprep.mubr.msk.f32.mxu1 %vm1243_vm0, %v1242_v4  ;;  %1128 = vmatpush3.bf16.msra.mxu1 %v1127_v21 }
 0x1ca   : > { %1087 = vmatprep.subr.mxu1 %v1242_v4 }
 0x1cd   : > { %1088 = vmatpush3.msk.msra.mxu1 %vm202_vm1, %v1010_v27 }
 0x1ce   : > { %1106 = vmatprep.subr.mxu1 %v1242_v4 }
 0x29b   : > { %v433_v22 = vpop.f32.mrb[2].mxu1 }
 0x29c   : > { %v438_v23 = vrot.slane %v433_v22, 4  ;;  %v1077_v24 = vpop.f32.mrb[3].mxu1 }
 0x29e   : > { %v440_v26 = vsel %vm202_vm1, %v354_v17, %v438_v23 }
 0x29f   : > { %1079 = vmatpush3.msra.mxu0 %v440_v26 }
 0x2a0   : > { %1081 = vmatmul.mubr.msk.f32.vlgmr.msra.gmra.mrb[2].mxu0 %vm280_vm3, %v1000_v25  ;;  %1092 = vmatprep.subr.mxu0 %v1242_v4 }
 0x2a1   : > { %1094 = vmatprep.mubr.msk.f32.mxu0 %vm1243_vm0, %v1242_v4 }
 0x373   : > { %v510_v28 = vpop.f32.mrb[2].mxu0 }
 0x374   : > { %v514_v29 = vmax.f32 %v510_v28, 0.0  ;;  %v1082_v30 = vpop.f32.mrb[3].mxu0 }
 0x376   : > { %1090 = vmatmul.mubr.msk.f32.vlgmr.msra.gmra.mrb[4].mxu1 %vm198_vm2, %v514_v29 }
 0x377   : > { %1108 = vmatprep.mubr.msk.f32.mxu1 %vm1243_vm0, %v1242_v4 }
 0x449   : > { %v593_v33 = vpop.f32.mrb[4].mxu1 }
 0x44a   : > { %v598_v34 = vrot.slane %v593_v33, 4  ;;  %v1091_v35 = vpop.f32.mrb[5].mxu1 }
 0x44c   : > { %v600_v38 = vsel %vm202_vm1, %v514_v29, %v598_v34 }
 0x44d   : > { %1093 = vmatpush3.msra.mxu0 %v600_v38 }
 0x44e   : > { %1095 = vmatmul.mubr.msk.f32.vlgmr.msra.gmra.mrb[4].mxu0 %vm280_vm3, %v1007_v36  ;;  %1129 = vmatprep.subr.bf16.mxu0 %v1241_v2 }
 0x44f   : > { %1131 = vmatpush3.bf16.msra.mxu0 %v1130_v37  ;;  %1103 = vmatprep.mubr.msk.f32.mxu0 %vm1243_vm0, %v1242_v4 }
 0x450   : > { %1101 = vmatprep.subr.mxu0 %v1242_v4 }
 0x453   : > { %1102 = vmatpush3.msk.msra.mxu0 %vm202_vm1, %v1017_v39 }
 0x521   : > { %v670_v40 = vpop.f32.mrb[4].mxu0 }
 0x522   : > { %v674_v41 = vmax.f32 %v670_v40, 0.0  ;;  %v1096_v42 = vpop.f32.mrb[5].mxu0 }
 0x524   : > { %1104 = vmatmul.mubr.msk.f32.vlgmr.msra.gmra.mrb[6].mxu0 %vm198_vm2, %v674_v41 }
 0x5f7   : > { %v753_v45 = vpop.f32.mrb[6].mxu0 }
 0x5f8   : > { %v758_v46 = vrot.slane %v753_v45, 4  ;;  %v1105_v47 = vpop.f32.mrb[7].mxu0 }
 0x5fa   : > { %v760_v50 = vsel %vm202_vm1, %v674_v41, %v758_v46 }
 0x5fb   : > { %1107 = vmatpush3.msra.mxu1 %v760_v50 }
 0x5fc   : > { %1109 = vmatmul.mubr.msk.f32.vlgmr.msra.gmra.mrb[6].mxu1 %vm280_vm3, %v1014_v48  ;;  %1132 = vmatprep.subr.bf16.mxu1 %v1241_v2 }
 0x5fd   : > { %1134 = vmatpush3.bf16.msra.mxu1 %v1133_v49  ;;  %1117 = vmatprep.mubr.msk.f32.mxu1 %vm1243_vm0, %v1242_v4 }
 0x5fe   : > { %1115 = vmatprep.subr.mxu1 %v1242_v4 }
 0x601   : > { %1116 = vmatpush3.msk.msra.mxu1 %vm202_vm1, %v837_v51 }
 0x6cf   : > { %v830_v52 = vpop.f32.mrb[6].mxu1 }
 0x6d0   : > { %v834_v53 = vmax.f32 %v830_v52, 0.0  ;;  %v1110_v54 = vpop.f32.mrb[7].mxu1 }
 0x6d2   : > { %1118 = vmatmul.mubr.msk.f32.vlgmr.msra.gmra.mrb[8].mxu1 %vm198_vm2, %v834_v53 }
 0x7a5   : > { %v910_v55 = vpop.f32.mrb[8].mxu1 }
 0x7a6   : > { %v914_v56 = vmax.f32 %v910_v55, 0.0  ;;  %v1119_v57 = vpop.f32.mrb[9].mxu1 }
 0x7a8   : > { %v915_v58 = vadd.f32 %v914_v56, %v1340_v6 }
 0x7aa   : > { %917 = vst.msk [vmem:[%s188_s13] sm:$0xf] %vm916_vm4, %v915_v58 }
 0x7ab   : > { %1190 = shalt.err (!%p1187_p3)
}
 0x7ac   : > { %s1191_s5 = scalar_lea.hbm %s1440_s23, 64  ;;  %s1195_s8 = scalar_lea.hbm %s1486_s4, 128 }
 0x7ad   : > { %p1192_p4 = scmp.ne.s32.totalorder %s1440_s23, %s1191_s5  ;;  %p1196_p9 = scmp.lt.u32.totalorder %s1440_s23, %s1486_s4 }
 0x7ae   : > { %p1197_p10 = scmp.lt.u32.totalorder %s1195_s8, %s1191_s5  ;;  %p1199_p12 = scmp.lt.u32.totalorder %s1191_s5, %s1440_s23 }
 0x7af   : > { %p1193_p7 = pnand %p1192_p4, %p1308_p5 }
 0x7b0   : > { %p1198_p11 = por %p1197_p10, %p1196_p9 }
 0x7b1   : > { %p1194_p8 = pneg %p1193_p7 }
 0x7b2   : > { %p1200_p13 = por %p1199_p12, %p1198_p11 }
 0x7b4   : > { %p1201_p0 = pnand %p1200_p13, %p1194_p8 }
 0x7b6   : > { %1204 = shalt.err (!%p1201_p0)
}
 0x7b7   : > { %1135 = dma.vmem_to_hbm [thread:$0]  (%p1308_p5), %s1442_s14, 64, %s1440_s23, %s919_s27  }
 0x7b8 PF: > { %p1141_p1 = scmp.ge.s32.totalorder %s1239_s18, 2  ;;  %s944_s11 = sand.u32 1, %s1227_s15  }
 0x7b9   : > { %s945_s12 = scalar_lea.sflag [#allocation3], %s944_s11 }
 0x7ba   : > { %p1138_p2 = pnand %p1141_p1, %p1312_p6 }
 0x7bc   : > { %1222 = dma.done.wait (!%p1138_p2), %s945_s12, 64  }
 0x7bd   : > { %1224 = vsyncadd (!%p1138_p2), %s945_s12, 4294967232  ;;  %p14_p3 = scmp.ge.s32.totalorder %s1295_s21, 4   ;;  %s1489_s15 = smov %s1231_s16 }
 0x7be   : > { %s1490_s16 = smov %s1235_s17  ;;  %s1491_s17 = smov %s1306_s24 }
 0x7bf   : > { %s1492_s18 = smov %s1295_s21  ;;  %16 = sbr.rel (!%p14_p3) target bundleno = 3 (0x3), region = 77 }
 0x7c6   :  { %950 = vsyncpa [#allocation3], 1 }
 0x7c7   :  { %952 = vsyncpa [#allocation3 + $0x1], 1 }

</bundles_post_ra>
